<compile_context>
chip_gen: v5e
topology: v5e:2x2
jax: 0.10.0
libtpu: 0.0.40
codegen_flags: <defaults>
</compile_context>

<pallas_src>
import jax
import jax.numpy as jnp
from jax import lax
from jax.experimental import pallas as pl
from jax.experimental.pallas import tpu as pltpu

IN_DIM = 64
HID_DIM = 128

# VMEM budget for the per-chunk working set (x double-buffer + Z scratch).
# Kept under v5e's 16 MiB default scoped limit with margin.
_VMEM_CHUNK_BUDGET = 12 * 1024 * 1024


def rnn_forward(x, w_ih, b_ih, w_hh, b_hh, *, tc_max=512, unroll=8):
    """x: (T, B, 64). w_ih: (128, 64), b_ih: (128,), w_hh: (128, 128), b_hh: (128,).
    Returns the final hidden state, shape (B, 128), float32."""
    T, B, in_dim = x.shape
    assert in_dim == IN_DIM

    Bp = ((B + 7) // 8) * 8                  # batch padded to f32 sublane multiple

    # Per-chunk VMEM bytes: x block is lane-padded 64->128 in VMEM and
    # double-buffered (x2), plus the Z scratch (x1): 3 * tc * Bp * 128 * 4.
    bytes_per_tc = 3 * Bp * HID_DIM * 4
    tc_fit = max(1, _VMEM_CHUNK_BUDGET // bytes_per_tc)
    tc = max(1, min(tc_max, T, tc_fit))      # timesteps per grid step
    n_chunks = pl.cdiv(T, tc)
    T_pad = n_chunks * tc
    rem = T - (n_chunks - 1) * tc            # static: 1..tc timesteps in last chunk

    # Host-side prep. Skip the zero-pad copy entirely when already aligned
    # (B % 8 == 0 and T % tc == 0): a contiguous reshape is free, no extra
    # HBM roundtrip. Otherwise pad once.
    x = jnp.asarray(x, jnp.float32)
    if Bp == B and T_pad == T:
        x2d = x.reshape(T * B, IN_DIM)
    else:
        x_p = jnp.zeros((T_pad, Bp, IN_DIM), jnp.float32).at[:T, :B, :].set(x)
        x2d = x_p.reshape(T_pad * Bp, IN_DIM)

    w_ih_t = jnp.asarray(w_ih, jnp.float32).T                   # (64, 128)
    w_hh_t = jnp.asarray(w_hh, jnp.float32).T                   # (128, 128)
    bias = (jnp.asarray(b_ih, jnp.float32)
            + jnp.asarray(b_hh, jnp.float32))[None, :]          # (1, 128) fused

    def rnn_kernel(x_ref, wih_ref, whh_ref, bias_ref, out_ref, z_ref):
        c = pl.program_id(0)

        # Hidden state lives in out_ref; same output block every grid step, so it
        # stays resident in VMEM across the whole (sequential) grid.
        @pl.when(c == 0)
        def _():
            out_ref[...] = jnp.zeros_like(out_ref)

        # Phase 1 (off the serial chain): input projection + fused bias for the
        # whole chunk as a single large MXU matmul (M = tc*Bp, K = 64, N = 128).
        z_ref[...] = (
            jnp.dot(x_ref[...], wih_ref[...], preferred_element_type=jnp.float32)
            + bias_ref[...]
        )

        # Phase 2: serial recurrence — only the (Bp,128)x(128,128) matmul + tanh
        # per step. W_hh loaded once per chunk (hoisted out of the loop).
        whh = whh_ref[...]

        def step(i, h):
            off = pl.multiple_of(i * Bp, Bp)
            z_i = z_ref[pl.ds(off, Bp), :]                       # (Bp, 128)
            return jnp.tanh(
                z_i + jnp.dot(h, whh, preferred_element_type=jnp.float32))

        def run_loop(n_steps):
            out_ref[...] = lax.fori_loop(
                0, n_steps, step, out_ref[...],
                unroll=max(1, min(unroll, n_steps)))

        if rem == tc:
            # All chunks are full: one branch-free loop, no padding mask anywhere.
            run_loop(tc)
        else:
            # Full chunks run unmasked; the last chunk runs only its `rem`
            # (static) valid timesteps — padded timesteps never touch the
            # serial chain.
            @pl.when(c < n_chunks - 1)
            def _():
                run_loop(tc)

            @pl.when(c == n_chunks - 1)
            def _():
                run_loop(rem)

    out = pl.pallas_call(
        rnn_kernel,
        out_shape=jax.ShapeDtypeStruct((Bp, HID_DIM), jnp.float32),
        grid_spec=pltpu.PrefetchScalarGridSpec(
            num_scalar_prefetch=0,
            grid=(n_chunks,),
            in_specs=[
                pl.BlockSpec((tc * Bp, IN_DIM), lambda c: (c, 0)),     # x chunk
                pl.BlockSpec((IN_DIM, HID_DIM), lambda c: (0, 0)),     # W_ih^T
                pl.BlockSpec((HID_DIM, HID_DIM), lambda c: (0, 0)),    # W_hh^T
                pl.BlockSpec((1, HID_DIM), lambda c: (0, 0)),          # fused bias
            ],
            out_specs=pl.BlockSpec((Bp, HID_DIM), lambda c: (0, 0)),
            scratch_shapes=[pltpu.VMEM((tc * Bp, HID_DIM), jnp.float32)],  # Z
        ),
        compiler_params=pltpu.CompilerParams(
            dimension_semantics=("arbitrary",),   # sequential recurrence over T
            vmem_limit_bytes=32 * 1024 * 1024,    # headroom; fits all generations
        ),
    )(x2d, w_ih_t, w_hh_t, bias)

    return out[:B]


def rnn_reference(x, w_ih, b_ih, w_hh, b_hh):
    """Plain-JAX reference mirroring the PyTorch loop exactly."""
    T, B, _ = x.shape
    h = jnp.zeros((HID_DIM,), jnp.float32)   # broadcasts to (B, 128) at step 0
    for t in range(T):
        h = jnp.tanh(h @ w_hh.T + b_hh + x[t] @ w_ih.T + b_ih)
    return h


def init_params(key):
    """Deterministic init mimicking torch.nn.Linear (uniform(-1/sqrt(fan_in)))."""
    k1, k2, k3, k4 = jax.random.split(key, 4)
    bound_ih = 1.0 / jnp.sqrt(IN_DIM)
    bound_hh = 1.0 / jnp.sqrt(HID_DIM)
    w_ih = jax.random.uniform(k1, (HID_DIM, IN_DIM), jnp.float32, -bound_ih, bound_ih)
    b_ih = jax.random.uniform(k2, (HID_DIM,), jnp.float32, -bound_ih, bound_ih)
    w_hh = jax.random.uniform(k3, (HID_DIM, HID_DIM), jnp.float32, -bound_hh, bound_hh)
    b_hh = jax.random.uniform(k4, (HID_DIM,), jnp.float32, -bound_hh, bound_hh)
    return w_ih, b_ih, w_hh, b_hh


if __name__ == "__main__":
    key = jax.random.PRNGKey(0)
    kp, kx = jax.random.split(key)

    SEQ, BATCH = 8, 2
    w_ih, b_ih, w_hh, b_hh = init_params(kp)
    x = jax.random.normal(kx, (SEQ, BATCH, IN_DIM), jnp.float32)

    out = jax.block_until_ready(rnn_forward(x, w_ih, b_ih, w_hh, b_hh))
    ref = rnn_reference(x, w_ih, b_ih, w_hh, b_hh)

    assert out.shape == (BATCH, HID_DIM), out.shape
    assert jnp.allclose(out, ref, atol=2e-5, rtol=1e-5), (
        float(jnp.max(jnp.abs(out - ref)))
    )

    print("KERNEL_OK")
</pallas_src>

<mosaic_0001>
module attributes {stable_mosaic.version = 11 : i64} {
  func.func @rnn_kernel(%arg0: i32, %arg1: memref<64x64xf32, #tpu.memory_space<vmem>>, %arg2: memref<64x128xf32, #tpu.memory_space<vmem>>, %arg3: memref<128x128xf32, #tpu.memory_space<vmem>>, %arg4: memref<1x128xf32, #tpu.memory_space<vmem>>, %arg5: memref<8x128xf32, #tpu.memory_space<vmem>>, %arg6: memref<64x128xf32, #tpu.memory_space<vmem>>) attributes {dimension_semantics = [#tpu.dimension_semantics<arbitrary>], iteration_bounds = array<i64: 1>, scalar_prefetch = 0 : i64, scratch_operands = 1 : i64, tpu.core_type = #tpu.core_type<tc>, window_params = [{transform_indices = @transform_0, window_bounds = array<i64: 64, 64>}, {pipeline_mode = #tpu.pipeline_mode<synchronous>, transform_indices = @transform_1, window_bounds = array<i64: 64, 128>}, {pipeline_mode = #tpu.pipeline_mode<synchronous>, transform_indices = @transform_2, window_bounds = array<i64: 128, 128>}, {pipeline_mode = #tpu.pipeline_mode<synchronous>, transform_indices = @transform_3, window_bounds = array<i64: 1, 128>}, {pipeline_mode = #tpu.pipeline_mode<synchronous>, transform_indices = @transform_4, window_bounds = array<i64: 8, 128>}]} {
    %c0_i32 = arith.constant 0 : i32
    %0 = arith.cmpi eq, %arg0, %c0_i32 : i32
    %1 = arith.extui %0 : i1 to i32
    %c0_i32_0 = arith.constant 0 : i32
    %2 = arith.cmpi ne, %1, %c0_i32_0 : i32
    scf.if %2 {
      %cst_39 = arith.constant 0.000000e+00 : f32
      %69 = vector.broadcast %cst_39 : f32 to vector<8x128xf32>
      %c0_40 = arith.constant 0 : index
      %c0_41 = arith.constant 0 : index
      %70 = vector.load %arg5[%c0_40, %c0_41] : memref<8x128xf32, #tpu.memory_space<vmem>>, vector<8x128xf32>
      tpu.vector_store %arg5[%c0_40, %c0_41], %69 {strides = array<i32>} : memref<8x128xf32, #tpu.memory_space<vmem>>, vector<8x128xf32>,
    } else {
    }
    %c0 = arith.constant 0 : index
    %c0_1 = arith.constant 0 : index
    %3 = vector.load %arg1[%c0, %c0_1] : memref<64x64xf32, #tpu.memory_space<vmem>>, vector<64x64xf32>
    %c0_2 = arith.constant 0 : index
    %c0_3 = arith.constant 0 : index
    %4 = vector.load %arg2[%c0_2, %c0_3] : memref<64x128xf32, #tpu.memory_space<vmem>>, vector<64x128xf32>
    %cst = arith.constant dense<0.000000e+00> : vector<64x128xf32>
    %5 = tpu.matmul %3, %4, %cst {dimension_numbers = #tpu.dot_dimension_numbers<[1], [0], [0], [1], [0, 0, 1, 1], [], []>} : vector<64x64xf32>, vector<64x128xf32>, vector<64x128xf32> -> vector<64x128xf32>
    %c0_4 = arith.constant 0 : index
    %c0_5 = arith.constant 0 : index
    %6 = vector.load %arg4[%c0_4, %c0_5] : memref<1x128xf32, #tpu.memory_space<vmem>>, vector<1x128xf32>
    %7 = vector.broadcast %6 : vector<1x128xf32> to vector<64x128xf32>
    %8 = arith.addf %5, %7 : vector<64x128xf32>
    %c0_6 = arith.constant 0 : index
    %c0_7 = arith.constant 0 : index
    %9 = vector.load %arg6[%c0_6, %c0_7] : memref<64x128xf32, #tpu.memory_space<vmem>>, vector<64x128xf32>
    tpu.vector_store %arg6[%c0_6, %c0_7], %8 {strides = array<i32>} : memref<64x128xf32, #tpu.memory_space<vmem>>, vector<64x128xf32>,
    %c0_8 = arith.constant 0 : index
    %c0_9 = arith.constant 0 : index
    %10 = vector.load %arg3[%c0_8, %c0_9] : memref<128x128xf32, #tpu.memory_space<vmem>>, vector<128x128xf32>
    %c0_10 = arith.constant 0 : index
    %c0_11 = arith.constant 0 : index
    %11 = vector.load %arg5[%c0_10, %c0_11] : memref<8x128xf32, #tpu.memory_space<vmem>>, vector<8x128xf32>
    %c0_i32_12 = arith.constant 0 : i32
    %c8_i32 = arith.constant 8 : i32
    %12 = arith.muli %c0_i32_12, %c8_i32 : i32
    %13 = tpu.assume_multiple %12, 8 : i32
    %14 = arith.index_cast %13 : i32 to index
    %c0_13 = arith.constant 0 : index
    %15 = vector.load %arg6[%14, %c0_13] : memref<64x128xf32, #tpu.memory_space<vmem>>, vector<8x128xf32>
    %cst_14 = arith.constant dense<0.000000e+00> : vector<8x128xf32>
    %16 = tpu.matmul %11, %10, %cst_14 {dimension_numbers = #tpu.dot_dimension_numbers<[1], [0], [0], [1], [0, 0, 1, 1], [], []>} : vector<8x128xf32>, vector<128x128xf32>, vector<8x128xf32> -> vector<8x128xf32>
    %17 = arith.addf %15, %16 : vector<8x128xf32>
    %18 = math.tanh %17 : vector<8x128xf32>
    %c1_i32 = arith.constant 1 : i32
    %c8_i32_15 = arith.constant 8 : i32
    %19 = arith.muli %c1_i32, %c8_i32_15 : i32
    %20 = tpu.assume_multiple %19, 8 : i32
    %21 = arith.index_cast %20 : i32 to index
    %c0_16 = arith.constant 0 : index
    %22 = vector.load %arg6[%21, %c0_16] : memref<64x128xf32, #tpu.memory_space<vmem>>, vector<8x128xf32>
    %cst_17 = arith.constant dense<0.000000e+00> : vector<8x128xf32>
    %23 = tpu.matmul %18, %10, %cst_17 {dimension_numbers = #tpu.dot_dimension_numbers<[1], [0], [0], [1], [0, 0, 1, 1], [], []>} : vector<8x128xf32>, vector<128x128xf32>, vector<8x128xf32> -> vector<8x128xf32>
    %24 = arith.addf %22, %23 : vector<8x128xf32>
    %25 = math.tanh %24 : vector<8x128xf32>
    %c2_i32 = arith.constant 2 : i32
    %c8_i32_18 = arith.constant 8 : i32
    %26 = arith.muli %c2_i32, %c8_i32_18 : i32
    %27 = tpu.assume_multiple %26, 8 : i32
    %28 = arith.index_cast %27 : i32 to index
    %c0_19 = arith.constant 0 : index
    %29 = vector.load %arg6[%28, %c0_19] : memref<64x128xf32, #tpu.memory_space<vmem>>, vector<8x128xf32>
    %cst_20 = arith.constant dense<0.000000e+00> : vector<8x128xf32>
    %30 = tpu.matmul %25, %10, %cst_20 {dimension_numbers = #tpu.dot_dimension_numbers<[1], [0], [0], [1], [0, 0, 1, 1], [], []>} : vector<8x128xf32>, vector<128x128xf32>, vector<8x128xf32> -> vector<8x128xf32>
    %31 = arith.addf %29, %30 : vector<8x128xf32>
    %32 = math.tanh %31 : vector<8x128xf32>
    %c3_i32 = arith.constant 3 : i32
    %c8_i32_21 = arith.constant 8 : i32
    %33 = arith.muli %c3_i32, %c8_i32_21 : i32
    %34 = tpu.assume_multiple %33, 8 : i32
    %35 = arith.index_cast %34 : i32 to index
    %c0_22 = arith.constant 0 : index
    %36 = vector.load %arg6[%35, %c0_22] : memref<64x128xf32, #tpu.memory_space<vmem>>, vector<8x128xf32>
    %cst_23 = arith.constant dense<0.000000e+00> : vector<8x128xf32>
    %37 = tpu.matmul %32, %10, %cst_23 {dimension_numbers = #tpu.dot_dimension_numbers<[1], [0], [0], [1], [0, 0, 1, 1], [], []>} : vector<8x128xf32>, vector<128x128xf32>, vector<8x128xf32> -> vector<8x128xf32>
    %38 = arith.addf %36, %37 : vector<8x128xf32>
    %39 = math.tanh %38 : vector<8x128xf32>
    %c4_i32 = arith.constant 4 : i32
    %c8_i32_24 = arith.constant 8 : i32
    %40 = arith.muli %c4_i32, %c8_i32_24 : i32
    %41 = tpu.assume_multiple %40, 8 : i32
    %42 = arith.index_cast %41 : i32 to index
    %c0_25 = arith.constant 0 : index
    %43 = vector.load %arg6[%42, %c0_25] : memref<64x128xf32, #tpu.memory_space<vmem>>, vector<8x128xf32>
    %cst_26 = arith.constant dense<0.000000e+00> : vector<8x128xf32>
    %44 = tpu.matmul %39, %10, %cst_26 {dimension_numbers = #tpu.dot_dimension_numbers<[1], [0], [0], [1], [0, 0, 1, 1], [], []>} : vector<8x128xf32>, vector<128x128xf32>, vector<8x128xf32> -> vector<8x128xf32>
    %45 = arith.addf %43, %44 : vector<8x128xf32>
    %46 = math.tanh %45 : vector<8x128xf32>
    %c5_i32 = arith.constant 5 : i32
    %c8_i32_27 = arith.constant 8 : i32
    %47 = arith.muli %c5_i32, %c8_i32_27 : i32
    %48 = tpu.assume_multiple %47, 8 : i32
    %49 = arith.index_cast %48 : i32 to index
    %c0_28 = arith.constant 0 : index
    %50 = vector.load %arg6[%49, %c0_28] : memref<64x128xf32, #tpu.memory_space<vmem>>, vector<8x128xf32>
    %cst_29 = arith.constant dense<0.000000e+00> : vector<8x128xf32>
    %51 = tpu.matmul %46, %10, %cst_29 {dimension_numbers = #tpu.dot_dimension_numbers<[1], [0], [0], [1], [0, 0, 1, 1], [], []>} : vector<8x128xf32>, vector<128x128xf32>, vector<8x128xf32> -> vector<8x128xf32>
    %52 = arith.addf %50, %51 : vector<8x128xf32>
    %53 = math.tanh %52 : vector<8x128xf32>
    %c6_i32 = arith.constant 6 : i32
    %c8_i32_30 = arith.constant 8 : i32
    %54 = arith.muli %c6_i32, %c8_i32_30 : i32
    %55 = tpu.assume_multiple %54, 8 : i32
    %56 = arith.index_cast %55 : i32 to index
    %c0_31 = arith.constant 0 : index
    %57 = vector.load %arg6[%56, %c0_31] : memref<64x128xf32, #tpu.memory_space<vmem>>, vector<8x128xf32>
    %cst_32 = arith.constant dense<0.000000e+00> : vector<8x128xf32>
    %58 = tpu.matmul %53, %10, %cst_32 {dimension_numbers = #tpu.dot_dimension_numbers<[1], [0], [0], [1], [0, 0, 1, 1], [], []>} : vector<8x128xf32>, vector<128x128xf32>, vector<8x128xf32> -> vector<8x128xf32>
    %59 = arith.addf %57, %58 : vector<8x128xf32>
    %60 = math.tanh %59 : vector<8x128xf32>
    %c7_i32 = arith.constant 7 : i32
    %c8_i32_33 = arith.constant 8 : i32
    %61 = arith.muli %c7_i32, %c8_i32_33 : i32
    %62 = tpu.assume_multiple %61, 8 : i32
    %63 = arith.index_cast %62 : i32 to index
    %c0_34 = arith.constant 0 : index
    %64 = vector.load %arg6[%63, %c0_34] : memref<64x128xf32, #tpu.memory_space<vmem>>, vector<8x128xf32>
    %cst_35 = arith.constant dense<0.000000e+00> : vector<8x128xf32>
    %65 = tpu.matmul %60, %10, %cst_35 {dimension_numbers = #tpu.dot_dimension_numbers<[1], [0], [0], [1], [0, 0, 1, 1], [], []>} : vector<8x128xf32>, vector<128x128xf32>, vector<8x128xf32> -> vector<8x128xf32>
    %66 = arith.addf %64, %65 : vector<8x128xf32>
    %67 = math.tanh %66 : vector<8x128xf32>
    %c8_i32_36 = arith.constant 8 : i32
    %c0_37 = arith.constant 0 : index
    %c0_38 = arith.constant 0 : index
    %68 = vector.load %arg5[%c0_37, %c0_38] : memref<8x128xf32, #tpu.memory_space<vmem>>, vector<8x128xf32>
    tpu.vector_store %arg5[%c0_37, %c0_38], %67 {strides = array<i32>} : memref<8x128xf32, #tpu.memory_space<vmem>>, vector<8x128xf32>,
    return
  }
  func.func @transform_0(%arg0: i32) -> (i32, i32) {
    %c0_i32 = arith.constant 0 : i32
    %c0_i32_0 = arith.constant 0 : i32
    return %arg0, %c0_i32 : i32, i32
  }
  func.func @transform_1(%arg0: i32) -> (i32, i32) {
    %c0_i32 = arith.constant 0 : i32
    %c0_i32_0 = arith.constant 0 : i32
    %c0_i32_1 = arith.constant 0 : i32
    return %c0_i32, %c0_i32_0 : i32, i32
  }
  func.func @transform_2(%arg0: i32) -> (i32, i32) {
    %c0_i32 = arith.constant 0 : i32
    %c0_i32_0 = arith.constant 0 : i32
    %c0_i32_1 = arith.constant 0 : i32
    return %c0_i32, %c0_i32_0 : i32, i32
  }
  func.func @transform_3(%arg0: i32) -> (i32, i32) {
    %c0_i32 = arith.constant 0 : i32
    %c0_i32_0 = arith.constant 0 : i32
    %c0_i32_1 = arith.constant 0 : i32
    return %c0_i32, %c0_i32_0 : i32, i32
  }
  func.func @transform_4(%arg0: i32) -> (i32, i32) {
    %c0_i32 = arith.constant 0 : i32
    %c0_i32_0 = arith.constant 0 : i32
    %c0_i32_1 = arith.constant 0 : i32
    return %c0_i32, %c0_i32_0 : i32, i32
  }
}

</mosaic_0001>

<bundles_post_ra>
// kernel: tpu_custom_call.1
= control target key start
LH: loop header
LB: loop body
LE: loop exit
PB: predicated region body
PF: predicated region fallthrough
CT: control target
= control target key end

     0   :  { %9 = vsyncpa [#allocation4], 0  ;;  %s750_s0 = inlined_call_operand.hbm [shape: f32[64,64], index: 0, kind: input, shape index: {}]   ;;  %s751_s1 = inlined_call_operand.hbm [shape: f32[64,128], index: 1, kind: input, shape index: {}]   ;;  %s752_s2 = inlined_call_operand.hbm [shape: f32[128,128], index: 2, kind: input, shape index: {}]   ;;  %s753_s3 = inlined_call_operand.vmem [shape: f32[1,128], index: 3, kind: input, shape index: {}]   ;;  %s754_s4 = inlined_call_operand.hbm [shape: f32[8,128], index: 4, kind: output, shape index: {}]  }
   0x1   :  { %10 = vsyncpa [#allocation7], 0 }
   0x2   :  { %11 = vsyncpa [#allocation5], 0  ;;  %s29_s17 = sshll.u32 %s751_s1, 4  ;;  %s525_s18 = smov [#allocation6]   ;;  %s30_s17 = int_to_ptr.hbm [resolvable:$true] %s29_s17 }
   0x3   :  { %s31_s19 = sshll.u32 %s525_s18, 4  ;;  %s16_s22 = sshll.u32 %s750_s0, 4  ;;  %s32_s19 = int_to_ptr.vmem [resolvable:$true] %s31_s19  ;;  %s17_s22 = int_to_ptr.hbm [resolvable:$true] %s16_s22 }
   0x4   :  { %s526_s23 = smov 128   ;;  %s527_s24 = smov 8  }
   0x5   :  { %37 = dma.hbm_to_vmem [thread:$0]  %s30_s17, 1024, %s32_s19, [#allocation7], %s526_s23, %s526_s23, %s527_s24  }
   0x6   :  { %s528_s25 = smov [#allocation3]   ;;  %s42_s29 = sshll.u32 %s752_s2, 4  ;;  %s43_s29 = int_to_ptr.hbm [resolvable:$true] %s42_s29 }
   0x7   :  { %s18_s26 = sshll.u32 %s528_s25, 4  ;;  %s529_s1 = smov [#allocation8]   ;;  %s19_s26 = int_to_ptr.vmem [resolvable:$true] %s18_s26 }
   0x8   :  { %24 = dma.hbm_to_vmem [thread:$0]  %s17_s22, 1024, %s19_s26, [#allocation4], %s526_s23, %s526_s23, %s527_s24  }
   0x9   :  { %s44_s30 = sshll.u32 %s529_s1, 4  ;;  %s45_s30 = int_to_ptr.vmem [resolvable:$true] %s44_s30 }
   0xa   :  { %50 = dma.hbm_to_vmem [thread:$0]  %s43_s29, 2048, %s45_s30, [#allocation7], %s526_s23, %s526_s23, %s527_s24  }
   0xb   :  { %519 = dma.done.wait [#allocation4], 1024  }
   0xc   :  { %520 = vsyncadd [#allocation4], 4294966272 }
   0xd   :  { %521 = dma.done.wait [#allocation7], 3072  }
   0xe   :  { %522 = vsyncadd [#allocation7], 4294964224  ;;  %v566_v0 = vld [vmem:[#allocation8 + $0x78] sm:$0xff]  ;;  %v568_v1 = vld [vmem:[#allocation8 + $0x70] sm:$0xff]  ;;  %vm90_vm0 = vcmask 523264   ;;  %v530_v25 = vmov 0.0  }
   0xf   :  { %182 = vmatpush.msra.mxu1 %v566_v0  ;;  %206 = vmatpush.msra.mxu2 %v566_v0  ;;  %v572_v2 = vld [vmem:[#allocation8 + $0x68] sm:$0xff]  ;;  %v85_v3 = vld [vmem:[#allocation6 + $0x38] sm:$0xff]  ;;  %v84_v4 = vld [vmem:[#allocation6 + $0x30] sm:$0xff]  ;;  %s380_s8 = sshll.u32 %s754_s4, 4  ;;  %s381_s8 = int_to_ptr.hbm [resolvable:$true] %s380_s8 }
  0x10   :  { %230 = vmatpush.msra.mxu3 %v566_v0  ;;  %123 = vmatpush.msra.mxu0 %v85_v3  ;;  %v576_v5 = vld [vmem:[#allocation8 + $0x60] sm:$0xff]  ;;  %v83_v6 = vld [vmem:[#allocation6 + $0x28] sm:$0xff]  ;;  %v581_v7 = vld [vmem:[#allocation8 + $0x58] sm:$0xff] }
  0x11   :  { %183 = vmatpush.msra.mxu1 %v568_v1  ;;  %207 = vmatpush.msra.mxu2 %v568_v1  ;;  %v82_v8 = vld [vmem:[#allocation6 + $0x20] sm:$0xff]  ;;  %v586_v9 = vld [vmem:[#allocation8 + $0x50] sm:$0xff]  ;;  %v81_v10 = vld [vmem:[#allocation6 + $0x18] sm:$0xff] }
  0x12   :  { %231 = vmatpush.msra.mxu3 %v568_v1  ;;  %124 = vmatpush.msra.mxu0 %v84_v4  ;;  %v591_v11 = vld [vmem:[#allocation8 + $0x48] sm:$0xff]  ;;  %v80_v12 = vld [vmem:[#allocation6 + $0x10] sm:$0xff]  ;;  %v596_v13 = vld [vmem:[#allocation8 + $0x40] sm:$0xff] }
  0x13   :  { %184 = vmatpush.msra.mxu1 %v572_v2  ;;  %208 = vmatpush.msra.mxu2 %v572_v2  ;;  %v79_v14 = vld [vmem:[#allocation6 + $0x8] sm:$0xff]  ;;  %v601_v15 = vld [vmem:[#allocation8 + $0x38] sm:$0xff]  ;;  %v78_v16 = vld [vmem:[#allocation6] sm:$0xff] }
  0x14   :  { %232 = vmatpush.msra.mxu3 %v572_v2  ;;  %125 = vmatpush.msra.mxu0 %v83_v6  ;;  %v70_v17 = vld [vmem:[#allocation3] sm:$0xff]  ;;  %v606_v18 = vld [vmem:[#allocation8 + $0x30] sm:$0xff]  ;;  %v611_v19 = vld [vmem:[#allocation8 + $0x28] sm:$0xff] }
  0x15   :  { %185 = vmatpush.msra.mxu1 %v576_v5  ;;  %209 = vmatpush.msra.mxu2 %v576_v5  ;;  %v617_v20 = vld [vmem:[#allocation8 + $0x20] sm:$0xff]  ;;  %v623_v21 = vld [vmem:[#allocation8 + $0x18] sm:$0xff]  ;;  %v629_v22 = vld [vmem:[#allocation8 + $0x10] sm:$0xff] }
  0x16   :  { %233 = vmatpush.msra.mxu3 %v576_v5  ;;  %126 = vmatpush.msra.mxu0 %v82_v8  ;;  %v635_v23 = vld [vmem:[#allocation8 + $0x8] sm:$0xff]  ;;  %v641_v24 = vld [vmem:[#allocation8] sm:$0xff]  ;;  %v72_v33 = vld [vmem:[#allocation3 + $0x10] sm:$0xff] }
  0x17   :  { %186 = vmatpush.msra.mxu1 %v581_v7  ;;  %210 = vmatpush.msra.mxu2 %v581_v7  ;;  %v71_v26 = vld [vmem:[#allocation3 + $0x8] sm:$0xff]  ;;  %v731_v27 = vld [vmem:[%s753_s3] ss:$0 sm:$0xff]  ;;  %v73_v39 = vld [vmem:[#allocation3 + $0x18] sm:$0xff]  ;;  %s531_s3 = smov [#allocation9]  }
  0x18   :  { %234 = vmatpush.msra.mxu3 %v581_v7  ;;  %127 = vmatpush.msra.mxu0 %v81_v10  ;;  %v74_v45 = vld [vmem:[#allocation3 + $0x20] sm:$0xff]  ;;  %v75_v51 = vld [vmem:[#allocation3 + $0x28] sm:$0xff]  ;;  %v76_v52 = vld [vmem:[#allocation3 + $0x30] sm:$0xff]  ;;  %s378_s5 = sshll.u32 %s531_s3, 4  ;;  %s379_s5 = int_to_ptr.vmem [resolvable:$true] %s378_s5 }
  0x19   :  { %187 = vmatpush.msra.mxu1 %v586_v9  ;;  %211 = vmatpush.msra.mxu2 %v586_v9  ;;  %v77_v58 = vld [vmem:[#allocation3 + $0x38] sm:$0xff] }
  0x1a   :  { %235 = vmatpush.msra.mxu3 %v586_v9  ;;  %128 = vmatpush.msra.mxu0 %v80_v12 }
  0x1b   :  { %188 = vmatpush.msra.mxu1 %v591_v11  ;;  %212 = vmatpush.msra.mxu2 %v591_v11 }
  0x1c   :  { %236 = vmatpush.msra.mxu3 %v591_v11  ;;  %129 = vmatpush.msra.mxu0 %v79_v14 }
  0x1d   :  { %189 = vmatpush.msra.mxu1 %v596_v13  ;;  %213 = vmatpush.msra.mxu2 %v596_v13 }
  0x1e   :  { %237 = vmatpush.msra.mxu3 %v596_v13  ;;  %130 = vmatpush.msra.mxu0 %v78_v16 }
  0x1f   :  { %190 = vmatpush.msra.mxu1 %v601_v15  ;;  %391 = vmatmul.msk.f32.vlgmr.msra.gmra.mxu0 %vm90_vm0, %v70_v17 }
  0x20   :  { %214 = vmatpush.msra.mxu2 %v601_v15  ;;  %238 = vmatpush.msra.mxu3 %v601_v15 }
  0x21   :  { %191 = vmatpush.msra.mxu1 %v606_v18  ;;  %326 = vmatpush.msrb.mxu0 %v566_v0 }
  0x22   :  { %215 = vmatpush.msra.mxu2 %v606_v18  ;;  %239 = vmatpush.msra.mxu3 %v606_v18 }
  0x23   :  { %192 = vmatpush.msra.mxu1 %v611_v19  ;;  %327 = vmatpush.msrb.mxu0 %v568_v1 }
  0x24   :  { %216 = vmatpush.msra.mxu2 %v611_v19  ;;  %240 = vmatpush.msra.mxu3 %v611_v19 }
  0x25   :  { %193 = vmatpush.msra.mxu1 %v617_v20  ;;  %328 = vmatpush.msrb.mxu0 %v572_v2 }
  0x26   :  { %217 = vmatpush.msra.mxu2 %v617_v20  ;;  %241 = vmatpush.msra.mxu3 %v617_v20 }
  0x27   :  { %194 = vmatpush.msra.mxu1 %v623_v21  ;;  %329 = vmatpush.msrb.mxu0 %v576_v5 }
  0x28   :  { %218 = vmatpush.msra.mxu2 %v623_v21  ;;  %242 = vmatpush.msra.mxu3 %v623_v21 }
  0x29   :  { %195 = vmatpush.msra.mxu1 %v629_v22  ;;  %330 = vmatpush.msrb.mxu0 %v581_v7 }
  0x2a   :  { %219 = vmatpush.msra.mxu2 %v629_v22  ;;  %243 = vmatpush.msra.mxu3 %v629_v22 }
  0x2b   :  { %196 = vmatpush.msra.mxu1 %v635_v23  ;;  %331 = vmatpush.msrb.mxu0 %v586_v9 }
  0x2c   :  { %220 = vmatpush.msra.mxu2 %v635_v23  ;;  %244 = vmatpush.msra.mxu3 %v635_v23 }
  0x2d   :  { %197 = vmatpush.msra.mxu1 %v641_v24  ;;  %332 = vmatpush.msrb.mxu0 %v591_v11 }
  0x2e   :  { %198 = vmatmul.f32.vlgmr.msra.gmra.mxu1 %v530_v25  ;;  %221 = vmatpush.msra.mxu2 %v641_v24 }
  0x2f   :  { %245 = vmatpush.msra.mxu3 %v641_v24  ;;  %254 = vmatpush.msrb.mxu1 %v566_v0 }
  0x30   :  { %278 = vmatpush.msrb.mxu2 %v566_v0  ;;  %333 = vmatpush.msrb.mxu0 %v596_v13 }
  0x31   :  { %302 = vmatpush.msrb.mxu3 %v566_v0  ;;  %255 = vmatpush.msrb.mxu1 %v568_v1 }
  0x32   :  { %279 = vmatpush.msrb.mxu2 %v568_v1  ;;  %334 = vmatpush.msrb.mxu0 %v601_v15 }
  0x33   :  { %303 = vmatpush.msrb.mxu3 %v568_v1  ;;  %256 = vmatpush.msrb.mxu1 %v572_v2 }
  0x34   :  { %280 = vmatpush.msrb.mxu2 %v572_v2  ;;  %335 = vmatpush.msrb.mxu0 %v606_v18 }
  0x35   :  { %304 = vmatpush.msrb.mxu3 %v572_v2  ;;  %257 = vmatpush.msrb.mxu1 %v576_v5 }
  0x36   :  { %281 = vmatpush.msrb.mxu2 %v576_v5  ;;  %336 = vmatpush.msrb.mxu0 %v611_v19 }
  0x37   :  { %305 = vmatpush.msrb.mxu3 %v576_v5  ;;  %258 = vmatpush.msrb.mxu1 %v581_v7 }
  0x38   :  { %282 = vmatpush.msrb.mxu2 %v581_v7  ;;  %337 = vmatpush.msrb.mxu0 %v617_v20 }
  0x39   :  { %306 = vmatpush.msrb.mxu3 %v581_v7  ;;  %259 = vmatpush.msrb.mxu1 %v586_v9 }
  0x3a   :  { %283 = vmatpush.msrb.mxu2 %v586_v9  ;;  %338 = vmatpush.msrb.mxu0 %v623_v21 }
  0x3b   :  { %307 = vmatpush.msrb.mxu3 %v586_v9  ;;  %260 = vmatpush.msrb.mxu1 %v591_v11 }
  0x3c   :  { %284 = vmatpush.msrb.mxu2 %v591_v11  ;;  %339 = vmatpush.msrb.mxu0 %v629_v22 }
  0x3d   :  { %308 = vmatpush.msrb.mxu3 %v591_v11  ;;  %261 = vmatpush.msrb.mxu1 %v596_v13 }
  0x3e   :  { %285 = vmatpush.msrb.mxu2 %v596_v13  ;;  %340 = vmatpush.msrb.mxu0 %v635_v23 }
  0x3f   :  { %309 = vmatpush.msrb.mxu3 %v596_v13  ;;  %262 = vmatpush.msrb.mxu1 %v601_v15 }
  0x40   :  { %286 = vmatpush.msrb.mxu2 %v601_v15  ;;  %341 = vmatpush.msrb.mxu0 %v641_v24 }
  0x41   :  { %310 = vmatpush.msrb.mxu3 %v601_v15  ;;  %263 = vmatpush.msrb.mxu1 %v606_v18 }
  0x42   :  { %287 = vmatpush.msrb.mxu2 %v606_v18  ;;  %392 = vmatmul.msk.f32.gmra.mxu0 %vm90_vm0, %v71_v26 }
  0x43   :  { %311 = vmatpush.msrb.mxu3 %v606_v18  ;;  %264 = vmatpush.msrb.mxu1 %v611_v19 }
  0x44   :  { %288 = vmatpush.msrb.mxu2 %v611_v19 }
  0x45   :  { %312 = vmatpush.msrb.mxu3 %v611_v19  ;;  %265 = vmatpush.msrb.mxu1 %v617_v20 }
  0x46   :  { %289 = vmatpush.msrb.mxu2 %v617_v20 }
  0x47   :  { %313 = vmatpush.msrb.mxu3 %v617_v20  ;;  %266 = vmatpush.msrb.mxu1 %v623_v21 }
  0x48   :  { %290 = vmatpush.msrb.mxu2 %v623_v21 }
  0x49   :  { %314 = vmatpush.msrb.mxu3 %v623_v21  ;;  %267 = vmatpush.msrb.mxu1 %v629_v22 }
  0x4a   :  { %291 = vmatpush.msrb.mxu2 %v629_v22  ;;  %393 = vmatmul.msk.f32.gmra.mxu0 %vm90_vm0, %v72_v33 }
  0x4b   :  { %315 = vmatpush.msrb.mxu3 %v629_v22  ;;  %268 = vmatpush.msrb.mxu1 %v635_v23 }
  0x4c   :  { %292 = vmatpush.msrb.mxu2 %v635_v23 }
  0x4d   :  { %316 = vmatpush.msrb.mxu3 %v635_v23  ;;  %269 = vmatpush.msrb.mxu1 %v641_v24 }
  0x4e   :  { %293 = vmatpush.msrb.mxu2 %v641_v24 }
  0x4f   :  { %317 = vmatpush.msrb.mxu3 %v641_v24  ;;  %350 = vmatpush.msra.mxu1 %v566_v0 }
  0x51   :  { %351 = vmatpush.msra.mxu1 %v568_v1 }
  0x52   :  { %394 = vmatmul.msk.f32.gmra.mxu0 %vm90_vm0, %v73_v39 }
  0x53   :  { %352 = vmatpush.msra.mxu1 %v572_v2 }
  0x55   :  { %353 = vmatpush.msra.mxu1 %v576_v5 }
  0x57   :  { %354 = vmatpush.msra.mxu1 %v581_v7 }
  0x59   :  { %355 = vmatpush.msra.mxu1 %v586_v9 }
  0x5a   :  { %395 = vmatmul.msk.f32.gmra.mxu0 %vm90_vm0, %v74_v45 }
  0x5b   :  { %356 = vmatpush.msra.mxu1 %v591_v11 }
  0x5d   :  { %357 = vmatpush.msra.mxu1 %v596_v13 }
  0x5f   :  { %358 = vmatpush.msra.mxu1 %v601_v15 }
  0x61   :  { %359 = vmatpush.msra.mxu1 %v606_v18 }
  0x62   :  { %396 = vmatmul.msk.f32.gmra.mxu0 %vm90_vm0, %v75_v51 }
  0x63   :  { %360 = vmatpush.msra.mxu1 %v611_v19 }
  0x65   :  { %361 = vmatpush.msra.mxu1 %v617_v20 }
  0x67   :  { %362 = vmatpush.msra.mxu1 %v623_v21 }
  0x69   :  { %363 = vmatpush.msra.mxu1 %v629_v22 }
  0x6a   :  { %397 = vmatmul.msk.f32.gmra.mxu0 %vm90_vm0, %v76_v52 }
  0x6b   :  { %364 = vmatpush.msra.mxu1 %v635_v23 }
  0x6d   :  { %365 = vmatpush.msra.mxu1 %v641_v24 }
  0x72   :  { %398 = vmatmul.msk.f32.gmra.mxu0 %vm90_vm0, %v77_v58 }
  0x9c   :  { %v132_v28 = vpop.f32.mrf.mxu0 }
  0x9d   :  { %v133_v29 = vadd.f32 %v731_v27, %v132_v28 }
  0xab   :  { %v199_v30 = vpop.f32.mrf.mxu1 }
  0xac   :  { %v202_v31 = vadd.f32 %v199_v30, %v133_v29 }
  0xae   :  { %407 = vtanh.f32 %v202_v31 }
  0xb4   :  { %v408_v32 = vpop.eup %407 }
  0xb5   :  { %222 = vmatmul.f32.vlgmr.msra.gmra.mxu2 %v408_v32 }
  0xbf   :  { %v135_v34 = vpop.f32.mrf.mxu0 }
  0xc0   :  { %v136_v35 = vadd.f32 %v731_v27, %v135_v34 }
  0xc7   :  { %v138_v40 = vpop.f32.mrf.mxu0 }
  0xc8   :  { %v139_v41 = vadd.f32 %v731_v27, %v138_v40 }
  0xcf   :  { %v141_v46 = vpop.f32.mrf.mxu0 }
  0xd0   :  { %v142_v47 = vadd.f32 %v731_v27, %v141_v46 }
  0xd7   :  { %v144_v53 = vpop.f32.mrf.mxu0 }
  0xd8   :  { %v145_v54 = vadd.f32 %v731_v27, %v144_v53 }
  0xdf   :  { %v147_v59 = vpop.f32.mrf.mxu0 }
  0xe0   :  { %v148_v60 = vadd.f32 %v731_v27, %v147_v59 }
  0xe7   :  { %v150_v0 = vpop.f32.mrf.mxu0 }
  0xe8   :  { %v151_v2 = vadd.f32 %v731_v27, %v150_v0 }
  0xef   :  { %v153_v1 = vpop.f32.mrf.mxu0 }
  0xf0   :  { %v154_v6 = vadd.f32 %v731_v27, %v153_v1 }
 0x138   :  { %v223_v36 = vpop.f32.mrf.mxu2 }
 0x139   :  { %v226_v37 = vadd.f32 %v223_v36, %v136_v35 }
 0x13b   :  { %409 = vtanh.f32 %v226_v37 }
 0x141   :  { %v410_v38 = vpop.eup %409 }
 0x142   :  { %246 = vmatmul.f32.vlgmr.msra.gmra.mxu3 %v410_v38 }
 0x1c5   :  { %v247_v42 = vpop.f32.mrf.mxu3 }
 0x1c6   :  { %v250_v43 = vadd.f32 %v247_v42, %v139_v41 }
 0x1c8   :  { %411 = vtanh.f32 %v250_v43 }
 0x1ce   :  { %v412_v44 = vpop.eup %411 }
 0x1cf   :  { %270 = vmatmul.f32.vlgmr.msrb.gmra.mxu1 %v412_v44 }
 0x24c   :  { %v271_v48 = vpop.f32.mrf.mxu1 }
 0x24d   :  { %v274_v49 = vadd.f32 %v271_v48, %v142_v47 }
 0x24f   :  { %413 = vtanh.f32 %v274_v49 }
 0x255   :  { %v414_v50 = vpop.eup %413 }
 0x256   :  { %294 = vmatmul.f32.vlgmr.msrb.gmra.mxu2 %v414_v50 }
 0x2d9   :  { %v295_v55 = vpop.f32.mrf.mxu2 }
 0x2da   :  { %v298_v56 = vadd.f32 %v295_v55, %v145_v54 }
 0x2dc   :  { %415 = vtanh.f32 %v298_v56 }
 0x2e2   :  { %v416_v57 = vpop.eup %415 }
 0x2e3   :  { %318 = vmatmul.f32.vlgmr.msrb.gmra.mxu3 %v416_v57 }
 0x366   :  { %v319_v61 = vpop.f32.mrf.mxu3 }
 0x367   :  { %v322_v62 = vadd.f32 %v319_v61, %v148_v60 }
 0x369   :  { %417 = vtanh.f32 %v322_v62 }
 0x36f   :  { %v418_v63 = vpop.eup %417 }
 0x370   :  { %342 = vmatmul.f32.vlgmr.msrb.gmra.mxu0 %v418_v63 }
 0x3ed   :  { %v343_v3 = vpop.f32.mrf.mxu0 }
 0x3ee   :  { %v346_v4 = vadd.f32 %v343_v3, %v151_v2 }
 0x3f0   :  { %419 = vtanh.f32 %v346_v4 }
 0x3f6   :  { %v420_v5 = vpop.eup %419 }
 0x3f7   :  { %366 = vmatmul.f32.vlgmr.msra.gmra.mxu1 %v420_v5 }
 0x474   :  { %v367_v7 = vpop.f32.mrf.mxu1 }
 0x475   :  { %v370_v8 = vadd.f32 %v367_v7, %v154_v6 }
 0x477   :  { %421 = vtanh.f32 %v370_v8 }
 0x47d   :  { %v422_v9 = vpop.eup %421 }
 0x47e   :  { %372 = vst [vmem:[#allocation9] sm:$0xff] %v422_v9 }
 0x47f   :  { %383 = dma.vmem_to_hbm [thread:$0]  %s379_s5, 128, %s381_s8, [#allocation5]  }
 0x480   :  { %523 = dma.done.wait [#allocation5], 128  }
 0x481   :  { %524 = vsyncadd [#allocation5], 4294967168 }
 0x482   :  { %388 = vsyncpa [#allocation4], 1 }
 0x483   :  { %389 = vsyncpa [#allocation7], 1 }
 0x484   :  { %390 = vsyncpa [#allocation5], 1 }

</bundles_post_ra>
